<compile_context>
chip_gen: v5e
topology: v5e:2x2
jax: 0.10.0
libtpu: 0.0.40
codegen_flags: <defaults>
</compile_context>

<pallas_src>
import jax
import jax.numpy as jnp
from jax import lax
from jax.experimental import pallas as pl
from jax.experimental.pallas import tpu as pltpu

EPS = 1e-5  # PyTorch BatchNorm2d default


def convblock_kernel(x_ref, w1_ref, s1_ref, w2_ref, s2_ref, o_ref):
    # x_ref : (nb, H, W*Cin)  bf16   nb images, unpadded, (W,C) lane-flattened
    # w1_ref: (3*W*Cin, W*Cout) bf16 banded conv1 weights (BN1 scale folded), dy taps stacked on K
    # s1_ref: (1, W*Cout) f32        conv1 bias + BN1 shift, tiled over W
    # w2_ref: (3*W*Cout, W*Cout) bf16 banded conv2 weights (BN2 scale folded), dy taps stacked on K
    # s2_ref: (1, W*Cout) f32        conv2 bias + BN2 shift, tiled over W
    # o_ref : (nb, H, W*Cout) f32    lane-dense output block
    nb, H, Wc = o_ref.shape

    def pad_rows_and_stack_taps(a):
        # a: (nb, H, K).  Returns (nb*H, 3*K): 1-row SAME zero halo per image (so images
        # never mix across the batch stack) and the three dy row-taps concatenated along K,
        # turning the whole conv into a single MXU matmul.
        k = a.shape[-1]
        zrow = jnp.zeros((nb, 1, k), a.dtype)
        ap = jnp.concatenate([zrow, a, zrow], axis=1)                     # (nb, H+2, K)
        lhs = jnp.concatenate([ap[:, 0:H], ap[:, 1:H + 1], ap[:, 2:H + 2]], axis=2)
        return lhs.reshape(nb * H, 3 * k)

    # ---- conv1 + bias + BN1 (folded): one bf16 MXU matmul, f32 accumulation ----
    lhs1 = pad_rows_and_stack_taps(x_ref[...])
    y = jnp.dot(lhs1, w1_ref[...], preferred_element_type=jnp.float32) + s1_ref[...]
    # nn.Dropout2d(p=0.2) is identity in eval/inference mode.

    # ---- conv2 + bias + BN2 + ReLU: one bf16 MXU matmul ----
    lhs2 = pad_rows_and_stack_taps(y.astype(jnp.bfloat16).reshape(nb, H, Wc))
    z = jnp.dot(lhs2, w2_ref[...], preferred_element_type=jnp.float32) + s2_ref[...]
    o_ref[...] = jnp.maximum(z, 0.0).reshape(nb, H, Wc).astype(o_ref.dtype)


def _banded_weights(w_hwio, in_pos, out_pos, col_offset):
    """Fold the column taps (dx) of a 3x3 HWIO conv kernel into banded matrices.

    Returns M of shape (3, in_pos*Cin, out_pos*Cout) with
      M[dy, b*Cin + ci, j*Cout + co] = w[dy, b - j + col_offset, ci, co]
    when that tap index is in [0, 3), else 0.  Out-of-range taps implement the SAME
    column zero-padding implicitly, so the input needs no column pad at all.
    """
    _, _, cin, cout = w_hwio.shape
    b = jnp.arange(in_pos)[:, None]              # (in_pos, 1)  input column position
    j = jnp.arange(out_pos)[None, :]             # (1, out_pos) output column position
    dx = b - j + col_offset                      # (in_pos, out_pos)
    valid = (dx >= 0) & (dx < 3)
    dx_c = jnp.clip(dx, 0, 2)
    w_x_first = jnp.transpose(w_hwio, (1, 0, 2, 3))        # (dx, dy, Cin, Cout)
    taps = w_x_first[dx_c]                                  # (in_pos, out_pos, 3, Cin, Cout)
    taps = jnp.where(valid[:, :, None, None, None], taps, 0.0)
    m = jnp.transpose(taps, (2, 0, 3, 1, 4))                # (dy, b, Cin, j, Cout)
    return m.reshape(3, in_pos * cin, out_pos * cout)


def conv_block_forward(x_nchw, params, batch_block=None):
    """x_nchw: (N, Cin, H, W) float32 -> (N, Cout, H, W) float32 (eval-mode ConvBlock)."""
    N, Cin, H, W = x_nchw.shape
    Cout = params["w1"].shape[-1]
    Wc = W * Cout

    # Fold eval-mode BatchNorm and the conv bias into weights + a single shift.
    def fold(gamma, beta, mean, var, bias, w):
        scale = gamma / jnp.sqrt(var + EPS)                  # (Cout,)
        shift = bias * scale + (beta - mean * scale)         # (Cout,)
        return w * scale, shift                              # scale folded into out-channels

    w1f, sh1 = fold(params["g1"], params["be1"], params["m1"], params["v1"],
                    params["b1"], params["w1"])
    w2f, sh2 = fold(params["g2"], params["be2"], params["m2"], params["v2"],
                    params["b2"], params["w2"])

    # Banded matrices map W -> W columns with the SAME column halo folded into the band.
    # dy taps are stacked along K so each conv is a single MXU matmul.  bf16 operands.
    w1m = _banded_weights(w1f, W, W, col_offset=1).reshape(3 * W * Cin, Wc).astype(jnp.bfloat16)
    w2m = _banded_weights(w2f, W, W, col_offset=1).reshape(3 * Wc, Wc).astype(jnp.bfloat16)
    sh1_l = jnp.tile(sh1, W).reshape(1, Wc)
    sh2_l = jnp.tile(sh2, W).reshape(1, Wc)

    # No padded HBM copy: only NCHW->NHWC transpose fused with the bf16 cast, then a free
    # contiguous reshape to the lane-flattened (W*Cin) form.
    # TODO(synk): in a full UNet, pass this NHWC/lane-flattened bf16 form between layers to
    # drop the transpose entirely.
    x_flat = jnp.transpose(x_nchw, (0, 2, 3, 1)).astype(jnp.bfloat16).reshape(N, H, W * Cin)

    # Batch images into the matmul M dimension: target >=128 MXU rows per grid step.
    # NOTE(v7x): with 2 TensorCores, cap batch_block at ceil(N/2) so both cores get a step.
    if batch_block is None:
        batch_block = max(1, (128 + H - 1) // H)
    nb = 1
    for d in range(min(batch_block, N), 0, -1):
        if N % d == 0:
            nb = d
            break

    out = pl.pallas_call(
        convblock_kernel,
        out_shape=jax.ShapeDtypeStruct((N, H, Wc), jnp.float32),
        grid_spec=pltpu.PrefetchScalarGridSpec(
            num_scalar_prefetch=0,
            grid=(N // nb,),
            in_specs=[
                pl.BlockSpec((nb, H, W * Cin), lambda n: (n, 0, 0)),
                pl.BlockSpec((3 * W * Cin, Wc), lambda n: (0, 0)),
                pl.BlockSpec((1, Wc), lambda n: (0, 0)),
                pl.BlockSpec((3 * Wc, Wc), lambda n: (0, 0)),
                pl.BlockSpec((1, Wc), lambda n: (0, 0)),
            ],
            out_specs=pl.BlockSpec((nb, H, Wc), lambda n: (n, 0, 0)),
        ),
        compiler_params=pltpu.CompilerParams(
            dimension_semantics=("parallel",)),   # batch blocks are independent
    )(x_flat, w1m, sh1_l, w2m, sh2_l)

    out = out.reshape(N, H, W, Cout)              # un-flatten the lane-dense last dim
    return jnp.transpose(out, (0, 3, 1, 2))       # NHWC -> NCHW


def reference_forward(x_nchw, params):
    """Pure-JAX f32 reference of the same (eval-mode) forward pass."""
    x = jnp.transpose(x_nchw, (0, 2, 3, 1))
    dn = ("NHWC", "HWIO", "NHWC")
    y = jax.lax.conv_general_dilated(
        x, params["w1"], (1, 1), "SAME", dimension_numbers=dn,
        precision=jax.lax.Precision.HIGHEST) + params["b1"]
    y = (y - params["m1"]) / jnp.sqrt(params["v1"] + EPS) * params["g1"] + params["be1"]
    z = jax.lax.conv_general_dilated(
        y, params["w2"], (1, 1), "SAME", dimension_numbers=dn,
        precision=jax.lax.Precision.HIGHEST) + params["b2"]
    z = (z - params["m2"]) / jnp.sqrt(params["v2"] + EPS) * params["g2"] + params["be2"]
    z = jnp.maximum(z, 0.0)
    return jnp.transpose(z, (0, 3, 1, 2))


def init_params(key, in_ch, out_ch):
    k1, k2 = jax.random.split(key)
    # conv weights stored directly in HWIO layout (synthetic deterministic init)
    w1 = jax.random.normal(k1, (3, 3, in_ch, out_ch), jnp.float32) * (1.0 / (3.0 * in_ch ** 0.5))
    w2 = jax.random.normal(k2, (3, 3, out_ch, out_ch), jnp.float32) * (1.0 / (3.0 * out_ch ** 0.5))
    b1 = 0.01 * jnp.arange(out_ch, dtype=jnp.float32)
    b2 = -0.01 * jnp.arange(out_ch, dtype=jnp.float32)
    return dict(
        w1=w1, b1=b1,
        g1=1.0 + 0.1 * jnp.arange(out_ch, dtype=jnp.float32),
        be1=0.05 * jnp.arange(out_ch, dtype=jnp.float32),
        m1=0.02 * jnp.arange(out_ch, dtype=jnp.float32),
        v1=1.0 + 0.03 * jnp.arange(out_ch, dtype=jnp.float32),
        w2=w2, b2=b2,
        g2=1.0 - 0.05 * jnp.arange(out_ch, dtype=jnp.float32),
        be2=-0.02 * jnp.arange(out_ch, dtype=jnp.float32),
        m2=-0.01 * jnp.arange(out_ch, dtype=jnp.float32),
        v2=1.0 + 0.01 * jnp.arange(out_ch, dtype=jnp.float32),
    )


if __name__ == "__main__":
    key = jax.random.PRNGKey(0)
    k_x, k_p = jax.random.split(key)

    N, C_IN, C_OUT, H, W = 2, 4, 8, 16, 16
    x = jax.random.normal(k_x, (N, C_IN, H, W), jnp.float32)
    params = init_params(k_p, C_IN, C_OUT)

    out = jax.block_until_ready(conv_block_forward(x, params))
    ref = jax.block_until_ready(reference_forward(x, params))

    assert out.shape == (N, C_OUT, H, W), out.shape
    max_err = float(jnp.max(jnp.abs(out - ref)))
    ref_scale = float(jnp.max(jnp.abs(ref)))
    # bf16 MXU operands (per perf review): ~0.4% per-tap rounding through two chained 3x3
    # convs (K=72 effective taps each) -> compare at a bf16-appropriate relative tolerance.
    tol = max(3e-2 * ref_scale, 5e-2)
    assert max_err <= tol, f"mismatch vs reference: {max_err} (ref max {ref_scale})"

    print("KERNEL_OK")
</pallas_src>

<mosaic_0001>
module attributes {stable_mosaic.version = 11 : i64} {
  func.func @convblock_kernel(%arg0: i32, %arg1: memref<2x16x64xbf16, #tpu.memory_space<vmem>>, %arg2: memref<192x128xbf16, #tpu.memory_space<vmem>>, %arg3: memref<1x128xf32, #tpu.memory_space<vmem>>, %arg4: memref<384x128xbf16, #tpu.memory_space<vmem>>, %arg5: memref<1x128xf32, #tpu.memory_space<vmem>>, %arg6: memref<2x16x128xf32, #tpu.memory_space<vmem>>) attributes {dimension_semantics = [#tpu.dimension_semantics<parallel>], iteration_bounds = array<i64: 1>, scalar_prefetch = 0 : i64, scratch_operands = 0 : i64, tpu.core_type = #tpu.core_type<tc>, window_params = [{transform_indices = @transform_0, window_bounds = array<i64: 2, 16, 64>}, {pipeline_mode = #tpu.pipeline_mode<synchronous>, transform_indices = @transform_1, window_bounds = array<i64: 192, 128>}, {pipeline_mode = #tpu.pipeline_mode<synchronous>, transform_indices = @transform_2, window_bounds = array<i64: 1, 128>}, {pipeline_mode = #tpu.pipeline_mode<synchronous>, transform_indices = @transform_3, window_bounds = array<i64: 384, 128>}, {pipeline_mode = #tpu.pipeline_mode<synchronous>, transform_indices = @transform_4, window_bounds = array<i64: 1, 128>}, {transform_indices = @transform_5, window_bounds = array<i64: 2, 16, 128>}]} {
    %c0 = arith.constant 0 : index
    %c0_0 = arith.constant 0 : index
    %c0_1 = arith.constant 0 : index
    %0 = vector.load %arg1[%c0, %c0_0, %c0_1] : memref<2x16x64xbf16, #tpu.memory_space<vmem>>, vector<2x16x64xbf16>
    %cst = arith.constant 0.000000e+00 : bf16
    %1 = vector.broadcast %cst : bf16 to vector<2x1x64xbf16>
    %2 = tpu.concatenate %1, %0, %1 in 1 : vector<2x1x64xbf16>, vector<2x16x64xbf16>, vector<2x1x64xbf16> -> vector<2x18x64xbf16>
    %3 = vector.extract_strided_slice %2 {offsets = [0, 0, 0], sizes = [2, 16, 64], strides = [1, 1, 1]} : vector<2x18x64xbf16> to vector<2x16x64xbf16>
    %4 = vector.extract_strided_slice %2 {offsets = [0, 1, 0], sizes = [2, 16, 64], strides = [1, 1, 1]} : vector<2x18x64xbf16> to vector<2x16x64xbf16>
    %5 = vector.extract_strided_slice %2 {offsets = [0, 2, 0], sizes = [2, 16, 64], strides = [1, 1, 1]} : vector<2x18x64xbf16> to vector<2x16x64xbf16>
    %6 = tpu.concatenate %3, %4, %5 in 2 : vector<2x16x64xbf16>, vector<2x16x64xbf16>, vector<2x16x64xbf16> -> vector<2x16x192xbf16>
    %7 = vector.shape_cast %6 : vector<2x16x192xbf16> to vector<32x192xbf16>
    %c0_2 = arith.constant 0 : index
    %c0_3 = arith.constant 0 : index
    %8 = vector.load %arg2[%c0_2, %c0_3] : memref<192x128xbf16, #tpu.memory_space<vmem>>, vector<192x128xbf16>
    %cst_4 = arith.constant dense<0.000000e+00> : vector<32x128xf32>
    %9 = tpu.matmul %7, %8, %cst_4 {dimension_numbers = #tpu.dot_dimension_numbers<[1], [0], [0], [1], [0, 0, 1, 1], [], []>} : vector<32x192xbf16>, vector<192x128xbf16>, vector<32x128xf32> -> vector<32x128xf32>
    %c0_5 = arith.constant 0 : index
    %c0_6 = arith.constant 0 : index
    %10 = vector.load %arg3[%c0_5, %c0_6] : memref<1x128xf32, #tpu.memory_space<vmem>>, vector<1x128xf32>
    %11 = vector.broadcast %10 : vector<1x128xf32> to vector<32x128xf32>
    %12 = arith.addf %9, %11 : vector<32x128xf32>
    %13 = arith.truncf %12 : vector<32x128xf32> to vector<32x128xbf16>
    %14 = vector.shape_cast %13 : vector<32x128xbf16> to vector<2x16x128xbf16>
    %cst_7 = arith.constant 0.000000e+00 : bf16
    %15 = vector.broadcast %cst_7 : bf16 to vector<2x1x128xbf16>
    %16 = tpu.concatenate %15, %14, %15 in 1 : vector<2x1x128xbf16>, vector<2x16x128xbf16>, vector<2x1x128xbf16> -> vector<2x18x128xbf16>
    %17 = vector.extract_strided_slice %16 {offsets = [0, 0, 0], sizes = [2, 16, 128], strides = [1, 1, 1]} : vector<2x18x128xbf16> to vector<2x16x128xbf16>
    %18 = vector.extract_strided_slice %16 {offsets = [0, 1, 0], sizes = [2, 16, 128], strides = [1, 1, 1]} : vector<2x18x128xbf16> to vector<2x16x128xbf16>
    %19 = vector.extract_strided_slice %16 {offsets = [0, 2, 0], sizes = [2, 16, 128], strides = [1, 1, 1]} : vector<2x18x128xbf16> to vector<2x16x128xbf16>
    %20 = tpu.concatenate %17, %18, %19 in 2 : vector<2x16x128xbf16>, vector<2x16x128xbf16>, vector<2x16x128xbf16> -> vector<2x16x384xbf16>
    %21 = vector.shape_cast %20 : vector<2x16x384xbf16> to vector<32x384xbf16>
    %c0_8 = arith.constant 0 : index
    %c0_9 = arith.constant 0 : index
    %22 = vector.load %arg4[%c0_8, %c0_9] : memref<384x128xbf16, #tpu.memory_space<vmem>>, vector<384x128xbf16>
    %cst_10 = arith.constant dense<0.000000e+00> : vector<32x128xf32>
    %23 = tpu.matmul %21, %22, %cst_10 {dimension_numbers = #tpu.dot_dimension_numbers<[1], [0], [0], [1], [0, 0, 1, 1], [], []>} : vector<32x384xbf16>, vector<384x128xbf16>, vector<32x128xf32> -> vector<32x128xf32>
    %c0_11 = arith.constant 0 : index
    %c0_12 = arith.constant 0 : index
    %24 = vector.load %arg5[%c0_11, %c0_12] : memref<1x128xf32, #tpu.memory_space<vmem>>, vector<1x128xf32>
    %25 = vector.broadcast %24 : vector<1x128xf32> to vector<32x128xf32>
    %26 = arith.addf %23, %25 : vector<32x128xf32>
    %cst_13 = arith.constant 0.000000e+00 : f32
    %27 = vector.broadcast %cst_13 : f32 to vector<32x128xf32>
    %28 = arith.maximumf %26, %27 : vector<32x128xf32>
    %29 = vector.shape_cast %28 : vector<32x128xf32> to vector<2x16x128xf32>
    %c0_14 = arith.constant 0 : index
    %c0_15 = arith.constant 0 : index
    %c0_16 = arith.constant 0 : index
    %30 = vector.load %arg6[%c0_14, %c0_15, %c0_16] : memref<2x16x128xf32, #tpu.memory_space<vmem>>, vector<2x16x128xf32>
    tpu.vector_store %arg6[%c0_14, %c0_15, %c0_16], %29 {strides = array<i32>} : memref<2x16x128xf32, #tpu.memory_space<vmem>>, vector<2x16x128xf32>,
    return
  }
  func.func @transform_0(%arg0: i32) -> (i32, i32, i32) {
    %c0_i32 = arith.constant 0 : i32
    %c0_i32_0 = arith.constant 0 : i32
    %c0_i32_1 = arith.constant 0 : i32
    return %arg0, %c0_i32, %c0_i32_0 : i32, i32, i32
  }
  func.func @transform_1(%arg0: i32) -> (i32, i32) {
    %c0_i32 = arith.constant 0 : i32
    %c0_i32_0 = arith.constant 0 : i32
    %c0_i32_1 = arith.constant 0 : i32
    return %c0_i32, %c0_i32_0 : i32, i32
  }
  func.func @transform_2(%arg0: i32) -> (i32, i32) {
    %c0_i32 = arith.constant 0 : i32
    %c0_i32_0 = arith.constant 0 : i32
    %c0_i32_1 = arith.constant 0 : i32
    return %c0_i32, %c0_i32_0 : i32, i32
  }
  func.func @transform_3(%arg0: i32) -> (i32, i32) {
    %c0_i32 = arith.constant 0 : i32
    %c0_i32_0 = arith.constant 0 : i32
    %c0_i32_1 = arith.constant 0 : i32
    return %c0_i32, %c0_i32_0 : i32, i32
  }
  func.func @transform_4(%arg0: i32) -> (i32, i32) {
    %c0_i32 = arith.constant 0 : i32
    %c0_i32_0 = arith.constant 0 : i32
    %c0_i32_1 = arith.constant 0 : i32
    return %c0_i32, %c0_i32_0 : i32, i32
  }
  func.func @transform_5(%arg0: i32) -> (i32, i32, i32) {
    %c0_i32 = arith.constant 0 : i32
    %c0_i32_0 = arith.constant 0 : i32
    %c0_i32_1 = arith.constant 0 : i32
    return %arg0, %c0_i32, %c0_i32_0 : i32, i32, i32
  }
}

</mosaic_0001>

<bundles_post_ra>
// kernel: tpu_custom_call.1
= control target key start
LH: loop header
LB: loop body
LE: loop exit
PB: predicated region body
PF: predicated region fallthrough
CT: control target
= control target key end

     0   :  { %10 = vsyncpa [#allocation3], 0  ;;  %s1054_s0 = inlined_call_operand.hbm [shape: bf16[2,16,64], index: 0, kind: input, shape index: {}]   ;;  %s1055_s1 = inlined_call_operand.hbm [shape: bf16[192,128], index: 1, kind: input, shape index: {}]   ;;  %s1056_s2 = inlined_call_operand.vmem [shape: f32[1,128], index: 2, kind: input, shape index: {}]   ;;  %s1057_s3 = inlined_call_operand.hbm [shape: bf16[384,128], index: 3, kind: input, shape index: {}]   ;;  %s1058_s4 = inlined_call_operand.vmem [shape: f32[1,128], index: 4, kind: input, shape index: {}]   ;;  %s1059_s5 = inlined_call_operand.hbm [shape: f32[2,16,128], index: 5, kind: output, shape index: {}]  }
   0x1   :  { %11 = vsyncpa [#allocation6], 0 }
   0x2   :  { %12 = vsyncpa [#allocation4], 0  ;;  %s30_s20 = sshll.u32 %s1055_s1, 4  ;;  %s958_s21 = smov [#allocation5]   ;;  %s31_s20 = int_to_ptr.hbm [resolvable:$true] %s30_s20 }
   0x3   :  { %s32_s22 = sshll.u32 %s958_s21, 4  ;;  %s17_s25 = sshll.u32 %s1054_s0, 4  ;;  %s33_s22 = int_to_ptr.vmem [resolvable:$true] %s32_s22  ;;  %s18_s25 = int_to_ptr.hbm [resolvable:$true] %s17_s25 }
   0x4   :  { %s959_s26 = smov 64   ;;  %s960_s27 = smov 4  }
   0x5   :  { %38 = dma.hbm_to_vmem [thread:$0]  %s31_s20, 1536, %s33_s22, [#allocation6], %s959_s26, %s959_s26, %s960_s27  }
   0x6   :  { %s961_s28 = smov [#allocation2]   ;;  %s45_s1 = sshll.u32 %s1057_s3, 4  ;;  %s46_s1 = int_to_ptr.hbm [resolvable:$true] %s45_s1 }
   0x7   :  { %s19_s29 = sshll.u32 %s961_s28, 4  ;;  %s962_s7 = smov [#allocation7]   ;;  %s20_s29 = int_to_ptr.vmem [resolvable:$true] %s19_s29 }
   0x8   :  { %25 = dma.hbm_to_vmem [thread:$0]  %s18_s25, 256, %s20_s29, [#allocation3], %s959_s26, %s959_s26, %s960_s27  }
   0x9   :  { %s47_s8 = sshll.u32 %s962_s7, 4  ;;  %s48_s8 = int_to_ptr.vmem [resolvable:$true] %s47_s8 }
   0xa   :  { %53 = dma.hbm_to_vmem [thread:$0]  %s46_s1, 3072, %s48_s8, [#allocation6], %s959_s26, %s959_s26, %s960_s27  }
   0xb   :  { %952 = dma.done.wait [#allocation3], 256  }
   0xc   :  { %953 = vsyncadd [#allocation3], 4294967040 }
   0xd   :  { %954 = dma.done.wait [#allocation6], 4608  }
   0xe   :  { %955 = vsyncadd [#allocation6], 4294962688  ;;  %v808_v0 = vld [vmem:[#allocation2] sm:$0xff]  ;;  %v809_v1 = vld [vmem:[#allocation2 + $0x8] sm:$0xff]  ;;  %vm101_vm0 = vcmask 1040384   ;;  %vm141_vm4 = vcmask 1046528  }
   0xf   :  { %v817_v2 = vld [vmem:[#allocation5 + $0x38] sm:$0xff]  ;;  %vm102_vm1 = vsmask.f32 256  ;;  %v84_v4 = vshrl.u32 %v808_v0, 16  ;;  %v87_v5 = vshll.u32 %v808_v0, 16  ;;  %v91_v6 = vshrl.u32 %v809_v1, 16 }
  0x10   :  { %v821_v3 = vld [vmem:[#allocation5 + $0x58] sm:$0xff]  ;;  %v94_v7 = vshll.u32 %v809_v1, 16  ;;  %261 = vmatpush.bf16.msra.mxu0 %v817_v2  ;;  %v816_v8 = vld [vmem:[#allocation5 + $0x30] sm:$0xff]  ;;  %vm1011_vm2 = vmand %vm101_vm0, %vm102_vm1  ;;  %vm108_vm3 = vsmask.f32 7424  ;;  %vm148_vm5 = vcmask 523264  }
  0x11   :  { %284 = vmatpush.bf16.msra.mxu1 %v821_v3  ;;  %v820_v9 = vld [vmem:[#allocation5 + $0x50] sm:$0xff]  ;;  %v86_v10 = vrot.slane %v84_v4, 7  ;;  %v93_v11 = vrot.slane %v91_v6, 7  ;;  %v815_v16 = vld [vmem:[#allocation5 + $0x28] sm:$0xff]  ;;  %v814_v25 = vld [vmem:[#allocation5 + $0x20] sm:$0xff]  ;;  %s640_s13 = sshll.u32 %s1059_s5, 4  ;;  %s641_s13 = int_to_ptr.hbm [resolvable:$true] %s640_s13 }
  0x12   :  { %v819_v18 = vld [vmem:[#allocation5 + $0x48] sm:$0xff]  ;;  %v818_v28 = vld [vmem:[#allocation5 + $0x40] sm:$0xff]  ;;  %v813_v35 = vld [vmem:[#allocation5 + $0x18] sm:$0xff]  ;;  %s964_s14 = smov 128   ;;  %s965_s15 = smov 8  }
  0x13   :  { %v89_v13 = vor.u32 %v87_v5, %v86_v10  ;;  %v106_v14 = vsel %vm1011_vm2, %v86_v10, 0  ;;  %v96_v15 = vor.u32 %v94_v7, %v93_v11  ;;  %v107_v23 = vsel %vm1011_vm2, %v93_v11, 0  ;;  %v812_v40 = vld [vmem:[#allocation5 + $0x10] sm:$0xff]  ;;  %v811_v42 = vld [vmem:[#allocation5 + $0x8] sm:$0xff]  ;;  %v810_v43 = vld [vmem:[#allocation5] sm:$0xff] }
  0x14   :  { %262 = vmatpush.bf16.msra.mxu0 %v816_v8  ;;  %v117_v17 = vshll.u32 %v106_v14, 16  ;;  %v143_v30 = vrot.slane %v106_v14, 1  ;;  %v129_v34 = vshll.u32 %v107_v23, 16  ;;  %v146_v45 = vrot.slane %v107_v23, 1  ;;  %v829_v47 = vld [vmem:[#allocation7 + $0x38] sm:$0xff]  ;;  %v828_v49 = vld [vmem:[#allocation7 + $0x30] sm:$0xff] }
  0x15   :  { %285 = vmatpush.bf16.msra.mxu1 %v820_v9  ;;  %v104_v19 = vsel %vm1011_vm2, 0, %v89_v13  ;;  %v105_v20 = vsel %vm1011_vm2, 0, %v96_v15  ;;  %v845_v48 = vld [vmem:[#allocation7 + $0xb8] sm:$0xff]  ;;  %569 = vmatpush.bf16.msra.mxu2 %v829_v47  ;;  %v844_v55 = vld [vmem:[#allocation7 + $0xb0] sm:$0xff]  ;;  %v827_v56 = vld [vmem:[#allocation7 + $0x28] sm:$0xff] }
  0x16   :  { %v110_v21 = vshrl.u32 %v104_v19, 16  ;;  %v112_v22 = vshll.u32 %v104_v19, 16  ;;  %v124_v24 = vshll.u32 %v105_v20, 16  ;;  %v119_v27 = vrot.slane %v117_v17, 1  ;;  %v837_v54 = vld [vmem:[#allocation7 + $0x78] sm:$0xff]  ;;  %v836_v57 = vld [vmem:[#allocation7 + $0x70] sm:$0xff] }
  0x17   :  { %v142_v29 = vrot.slane %v104_v19, 1  ;;  %v122_v32 = vshrl.u32 %v105_v20, 16  ;;  %v131_v39 = vrot.slane %v129_v34, 1  ;;  %v145_v44 = vrot.slane %v105_v20, 1  ;;  %588 = vmatpush.bf16.msra.mxu3 %v837_v54  ;;  %v843_v58 = vld [vmem:[#allocation7 + $0xa8] sm:$0xff]  ;;  %v826_v59 = vld [vmem:[#allocation7 + $0x20] sm:$0xff] }
  0x18   :  { %263 = vmatpush.bf16.msra.mxu0 %v815_v16  ;;  %v114_v26 = vrot.slane %v112_v22, 1  ;;  %v126_v33 = vrot.slane %v124_v24, 1  ;;  %v835_v60 = vld [vmem:[#allocation7 + $0x68] sm:$0xff]  ;;  %v842_v61 = vld [vmem:[#allocation7 + $0xa0] sm:$0xff]  ;;  %v825_v62 = vld [vmem:[#allocation7 + $0x18] sm:$0xff] }
  0x19   :  { %286 = vmatpush.bf16.msra.mxu1 %v819_v18  ;;  %v144_v37 = vsel %vm141_vm4, %v142_v29, %v143_v30  ;;  %v147_v46 = vsel %vm141_vm4, %v145_v44, %v146_v45  ;;  %570 = vmatpush.bf16.msra.mxu2 %v828_v49  ;;  %v834_v63 = vld [vmem:[#allocation7 + $0x60] sm:$0xff]  ;;  %v841_v0 = vld [vmem:[#allocation7 + $0x98] sm:$0xff]  ;;  %v824_v1 = vld [vmem:[#allocation7 + $0x10] sm:$0xff] }
  0x1a   :  { %v115_v31 = vor.u32 %v114_v26, %v110_v21  ;;  %v127_v38 = vor.u32 %v126_v33, %v122_v32  ;;  %v833_v2 = vld [vmem:[#allocation7 + $0x58] sm:$0xff]  ;;  %v840_v3 = vld [vmem:[#allocation7 + $0x90] sm:$0xff]  ;;  %v823_v4 = vld [vmem:[#allocation7 + $0x8] sm:$0xff] }
  0x1b   :  { %589 = vmatpush.bf16.msra.mxu3 %v836_v57  ;;  %v832_v5 = vld [vmem:[#allocation7 + $0x50] sm:$0xff]  ;;  %v839_v6 = vld [vmem:[#allocation7 + $0x88] sm:$0xff]  ;;  %v822_v7 = vld [vmem:[#allocation7] sm:$0xff] }
  0x1c   :  { %264 = vmatpush.bf16.msra.mxu0 %v814_v25  ;;  %v120_v36 = vsel %vm108_vm3, %v115_v31, %v119_v27  ;;  %v132_v41 = vsel %vm108_vm3, %v127_v38, %v131_v39  ;;  %v831_v8 = vld [vmem:[#allocation7 + $0x48] sm:$0xff]  ;;  %v838_v9 = vld [vmem:[#allocation7 + $0x80] sm:$0xff]  ;;  %v854_v13 = vld [vmem:[%s1056_s2] ss:$0 sm:$0xff] }
  0x1d   :  { %287 = vmatpush.bf16.msra.mxu1 %v818_v28  ;;  %133 = vrot.lane.b32.xlu0 %v120_v36, %s959_s26  ;;  %v830_v11 = vld [vmem:[#allocation7 + $0x40] sm:$0xff]  ;;  %v855_v12 = vld [vmem:[%s1058_s4] ss:$0 sm:$0xff]  ;;  %s963_s4 = smov [#allocation8]  }
  0x1e   :  { %571 = vmatpush.bf16.msra.mxu2 %v827_v56  ;;  %s638_s10 = sshll.u32 %s963_s4, 4  ;;  %s639_s10 = int_to_ptr.vmem [resolvable:$true] %s638_s10 }
  0x1f   :  { %590 = vmatpush.bf16.msra.mxu3 %v835_v60 }
  0x20   :  { %265 = vmatpush.bf16.msra.mxu0 %v813_v35  ;;  %710 = vmatmul.msk.bf16.vlgmr.msra.gmra.mxu1 %vm148_vm5, %v144_v37 }
  0x21   :  { %607 = vmatpush.bf16.msrb.mxu1 %v845_v48 }
  0x22   :  { %572 = vmatpush.bf16.msra.mxu2 %v826_v59 }
  0x23   :  { %591 = vmatpush.bf16.msra.mxu3 %v834_v63 }
  0x24   :  { %266 = vmatpush.bf16.msra.mxu0 %v812_v40 }
  0x25   :  { %135 = vrot.lane.b32.xlu0 %v132_v41, %s959_s26  ;;  %608 = vmatpush.bf16.msrb.mxu1 %v844_v55 }
  0x26   :  { %573 = vmatpush.bf16.msra.mxu2 %v825_v62 }
  0x27   :  { %592 = vmatpush.bf16.msra.mxu3 %v833_v2 }
  0x28   :  { %267 = vmatpush.bf16.msra.mxu0 %v811_v42 }
  0x29   :  { %609 = vmatpush.bf16.msrb.mxu1 %v843_v58 }
  0x2a   :  { %574 = vmatpush.bf16.msra.mxu2 %v824_v1 }
  0x2b   :  { %593 = vmatpush.bf16.msra.mxu3 %v832_v5 }
  0x2c   :  { %268 = vmatpush.bf16.msra.mxu0 %v810_v43 }
  0x2d   :  { %610 = vmatpush.bf16.msrb.mxu1 %v842_v61 }
  0x2e   :  { %575 = vmatpush.bf16.msra.mxu2 %v823_v4 }
  0x2f   :  { %594 = vmatpush.bf16.msra.mxu3 %v831_v8 }
  0x30   :  { %711 = vmatmul.msk.bf16.gmra.mxu1 %vm148_vm5, %v147_v46 }
  0x31   :  { %611 = vmatpush.bf16.msrb.mxu1 %v841_v0 }
  0x32   :  { %576 = vmatpush.bf16.msra.mxu2 %v822_v7 }
  0x33   :  { %595 = vmatpush.bf16.msra.mxu3 %v830_v11 }
  0x35   :  { %612 = vmatpush.bf16.msrb.mxu1 %v840_v3 }
  0x39   :  { %613 = vmatpush.bf16.msrb.mxu1 %v839_v6 }
  0x3d   :  { %614 = vmatpush.bf16.msrb.mxu1 %v838_v9 }
  0x8f   :  { %v134_v50 = vpop.permute.xlu0 %133 }
  0x90   :  { %v150_v51 = vsel %vm148_vm5, %v104_v19, %v134_v50 }
  0x91   :  { %269 = vmatmul.bf16.vlgmr.msra.gmra.mxu0 %v150_v51 }
  0x97   :  { %v136_v52 = vpop.permute.xlu0 %135 }
  0x98   :  { %v153_v53 = vsel %vm148_vm5, %v105_v20, %v136_v52 }
  0x9d   :  { %v289_v10 = vpop.f32.mrf.mxu1 }
  0xa1   :  { %274 = vmatmul.bf16.gmra.mxu0 %v153_v53 }
  0xa5   :  { %v291_v16 = vpop.f32.mrf.mxu1 }
  0xad   :  { %v294_v25 = vpop.f32.mrf.mxu1 }
  0xb5   :  { %v296_v38 = vpop.f32.mrf.mxu1 }
 0x10e   :  { %v270_v14 = vpop.f32.mrf.mxu0 }
 0x10f   :  { %v271_v15 = vadd.f32 %v854_v13, %v270_v14 }
 0x111   :  { %v290_v17 = vadd.f32 %v289_v10, %v271_v15 }
 0x113   :  { %v299_v20 = vpack.c.bf16 %v290_v17, %v290_v17 }
 0x115   :  { %v307_v23 = vunpack.c.l.b16 %v299_v20 }
 0x116   :  { %v272_v18 = vpop.f32.mrf.mxu0 }
 0x117   :  { %v273_v19 = vadd.f32 %v854_v13, %v272_v18 }
 0x119   :  { %v292_v21 = vadd.f32 %v291_v16, %v273_v19 }
 0x11b   :  { %v300_v22 = vpack.c.bf16 %v292_v21, %v292_v21 }
 0x11d   :  { %v308_v24 = vunpack.c.l.b16 %v300_v22 }
 0x11e   :  { %v275_v26 = vpop.f32.mrf.mxu0 }
 0x11f   :  { %v311_v27 = vpack.c.b16 %v308_v24, %v307_v23  ;;  %v276_v29 = vadd.f32 %v854_v13, %v275_v26 }
 0x121   :  { %v314_v28 = vshrl.u32 %v311_v27, 16  ;;  %v317_v31 = vshll.u32 %v311_v27, 16  ;;  %v295_v32 = vadd.f32 %v294_v25, %v276_v29 }
 0x123   :  { %v316_v30 = vrot.slane %v314_v28, 7  ;;  %v301_v43 = vpack.c.bf16 %v295_v32, %v295_v32 }
 0x125   :  { %v319_v33 = vor.u32 %v317_v31, %v316_v30  ;;  %v333_v34 = vsel %vm1011_vm2, %v316_v30, 0  ;;  %v309_v51 = vunpack.c.l.b16 %v301_v43 }
 0x126   :  { %v277_v35 = vpop.f32.mrf.mxu0  ;;  %v366_v40 = vrot.slane %v333_v34, 1  ;;  %v343_v42 = vshll.u32 %v333_v34, 16 }
 0x127   :  { %v278_v36 = vadd.f32 %v854_v13, %v277_v35  ;;  %v331_v37 = vsel %vm1011_vm2, 0, %v319_v33 }
 0x128   :  { %577 = vmatmul.bf16.vlgmr.msra.gmra.mxu2 %v331_v37  ;;  %v365_v39 = vrot.slane %v331_v37, 1  ;;  %v338_v41 = vshll.u32 %v331_v37, 16  ;;  %v336_v46 = vshrl.u32 %v331_v37, 16  ;;  %v345_v50 = vrot.slane %v343_v42, 1 }
 0x129   :  { %v297_v44 = vadd.f32 %v296_v38, %v278_v36 }
 0x12a   :  { %v367_v45 = vsel %vm141_vm4, %v365_v39, %v366_v40  ;;  %v340_v47 = vrot.slane %v338_v41, 1 }
 0x12b   :  { %v302_v48 = vpack.c.bf16 %v297_v44, %v297_v44  ;;  %615 = vmatmul.bf16.vlgmr.msrb.gmra.mxu1 %v367_v45 }
 0x12c   :  { %v341_v49 = vor.u32 %v340_v47, %v336_v46 }
 0x12d   :  { %v310_v52 = vunpack.c.l.b16 %v302_v48 }
 0x12e   :  { %v346_v53 = vsel %vm108_vm3, %v341_v49, %v345_v50 }
 0x12f   :  { %v312_v54 = vpack.c.b16 %v310_v52, %v309_v51  ;;  %596 = vmatmul.bf16.vlgmr.msra.gmra.mxu3 %v346_v53 }
 0x131   :  { %v321_v55 = vshrl.u32 %v312_v54, 16  ;;  %v324_v57 = vshll.u32 %v312_v54, 16 }
 0x133   :  { %v323_v56 = vrot.slane %v321_v55, 7 }
 0x135   :  { %v326_v58 = vor.u32 %v324_v57, %v323_v56  ;;  %v334_v59 = vsel %vm1011_vm2, %v323_v56, 0 }
 0x136   :  { %v369_v62 = vrot.slane %v334_v59, 1  ;;  %v355_v0 = vshll.u32 %v334_v59, 16 }
 0x137   :  { %v332_v60 = vsel %vm1011_vm2, 0, %v326_v58 }
 0x138   :  { %582 = vmatmul.bf16.gmra.mxu2 %v332_v60  ;;  %v368_v61 = vrot.slane %v332_v60, 1  ;;  %v350_v63 = vshll.u32 %v332_v60, 16  ;;  %v348_v2 = vshrl.u32 %v332_v60, 16  ;;  %v357_v5 = vrot.slane %v355_v0, 1 }
 0x13a   :  { %v370_v1 = vsel %vm141_vm4, %v368_v61, %v369_v62  ;;  %v352_v3 = vrot.slane %v350_v63, 1 }
 0x13b   :  { %620 = vmatmul.bf16.gmra.mxu1 %v370_v1 }
 0x13c   :  { %v353_v4 = vor.u32 %v352_v3, %v348_v2 }
 0x13e   :  { %v358_v6 = vsel %vm108_vm3, %v353_v4, %v357_v5 }
 0x13f   :  { %601 = vmatmul.bf16.gmra.mxu3 %v358_v6 }
 0x1a8   :  { %v616_v8 = vpop.f32.mrf.mxu1 }
 0x1ab   :  { %v578_v7 = vpop.f32.mrf.mxu2 }
 0x1ac   :  { %v579_v9 = vadd.f32 %v855_v12, %v578_v7 }
 0x1b0   :  { %v618_v16 = vpop.f32.mrf.mxu1 }
 0x1b2   :  { %v597_v10 = vpop.f32.mrf.mxu3 }
 0x1b3   :  { %v598_v11 = vadd.f32 %v597_v10, %v579_v9  ;;  %v580_v13 = vpop.f32.mrf.mxu2 }
 0x1b4   :  { %v581_v17 = vadd.f32 %v855_v12, %v580_v13 }
 0x1b5   :  { %v617_v14 = vadd.f32 %v616_v8, %v598_v11 }
 0x1b7   :  { %v626_v15 = vmax.f32 %v617_v14, 0.0 }
 0x1b8   :  { %v621_v24 = vpop.f32.mrf.mxu1 }
 0x1b9   :  { %630 = vst [vmem:[#allocation8] sm:$0xff] %v626_v15 }
 0x1ba   :  { %v599_v18 = vpop.f32.mrf.mxu3 }
 0x1bb   :  { %v600_v19 = vadd.f32 %v599_v18, %v581_v17  ;;  %v583_v20 = vpop.f32.mrf.mxu2 }
 0x1bc   :  { %v584_v23 = vadd.f32 %v855_v12, %v583_v20 }
 0x1bd   :  { %v619_v21 = vadd.f32 %v618_v16, %v600_v19 }
 0x1bf   :  { %v627_v22 = vmax.f32 %v619_v21, 0.0 }
 0x1c0   :  { %v623_v33 = vpop.f32.mrf.mxu1 }
 0x1c1   :  { %631 = vst [vmem:[#allocation8 + $0x8] sm:$0xff] %v627_v22 }
 0x1c2   :  { %v602_v25 = vpop.f32.mrf.mxu3 }
 0x1c3   :  { %v603_v26 = vadd.f32 %v602_v25, %v584_v23  ;;  %v585_v28 = vpop.f32.mrf.mxu2 }
 0x1c4   :  { %v586_v30 = vadd.f32 %v855_v12, %v585_v28 }
 0x1c5   :  { %v622_v27 = vadd.f32 %v621_v24, %v603_v26 }
 0x1c7   :  { %v628_v29 = vmax.f32 %v622_v27, 0.0 }
 0x1c9   :  { %632 = vst [vmem:[#allocation8 + $0x10] sm:$0xff] %v628_v29 }
 0x1ca   :  { %v604_v31 = vpop.f32.mrf.mxu3 }
 0x1cb   :  { %v605_v32 = vadd.f32 %v604_v31, %v586_v30 }
 0x1cd   :  { %v624_v34 = vadd.f32 %v623_v33, %v605_v32 }
 0x1cf   :  { %v629_v35 = vmax.f32 %v624_v34, 0.0 }
 0x1d1   :  { %633 = vst [vmem:[#allocation8 + $0x18] sm:$0xff] %v629_v35 }
 0x1d2   :  { %646 = dma.vmem_to_hbm [thread:$0]  %s639_s10, 512, %s641_s13, [#allocation4], %s964_s14, %s964_s14, %s965_s15  }
 0x1d3   :  { %956 = dma.done.wait [#allocation4], 512  }
 0x1d4   :  { %957 = vsyncadd [#allocation4], 4294966784 }
 0x1d5   :  { %651 = vsyncpa [#allocation3], 1 }
 0x1d6   :  { %652 = vsyncpa [#allocation6], 1 }
 0x1d7   :  { %653 = vsyncpa [#allocation4], 1 }

</bundles_post_ra>
